<compile_context>
chip_gen: v6e
topology: v6e:2x2x1
jax: 0.10.0
libtpu: 0.0.40
codegen_flags: <defaults>
</compile_context>

<pallas_src>
import jax
import jax.numpy as jnp
from jax.experimental import pallas as pl
from jax.experimental.pallas import tpu as pltpu

_LANES = 128
_MIN_TILE = 8 * _LANES          # 1024 elements: one (8,128) f32 tile


def _main_kernel(p_ref, x_ref, o_ref):
    """p_ref: SMEM (13,) f32, lane-parity-ordered packed coefficients:
         [c_self_e, c_self_o, c_part_e, c_part_o, c_bias_e, c_bias_o,
          d_self_e, d_self_o, d_part_e, d_part_o, d_bias_e, d_bias_o, alpha/2]
       x_ref / o_ref: (rb, 128) blocks of the interleaved flat view of x:
       even lanes hold feature 0, odd lanes hold feature 1 of each sample.
    """
    x = x_ref[...].astype(jnp.float32)                       # (rb, 128)

    lane = jax.lax.broadcasted_iota(jnp.int32, (1, _LANES), 1)
    even = (lane & 1) == 0                                   # (1, 128) bool

    def lane_const(e_idx, o_idx):
        # per-lane-parity coefficient vector built from two SMEM scalars
        return jnp.where(even, p_ref[e_idx], p_ref[o_idx])   # (1, 128) f32

    def partner(t):
        # adjacent-pair swap along lanes: even lane <- lane+1, odd <- lane-1.
        # Two XLU lane rolls; wraparound lanes are masked out by the select.
        return jnp.where(even, pltpu.roll(t, 127, 1), pltpu.roll(t, 1, 1))

    # Composed affine #1 (A.l1 -> B.a.l1 -> B.l1 -> C.l1) + ReLU (C).
    h = jnp.maximum(
        x * lane_const(0, 1) + partner(x) * lane_const(2, 3) + lane_const(4, 5),
        0.0)

    # Composed affine #2 (D.b.a.l1 -> D.b.l1), pre-scaled by 0.5 so that
    # alpha * sigmoid(y) == s + s * tanh(y / 2), s = alpha / 2.
    y_half = (h * lane_const(6, 7) + partner(h) * lane_const(8, 9)
              + lane_const(10, 11))
    s = p_ref[12]
    o_ref[...] = (s * jnp.tanh(y_half) + s).astype(o_ref.dtype)


def _compose_params(params):
    """Fold the six (W, b) pairs + alpha into one packed (13,) f32 vector.

    Running affine is y = x @ M + c (row vectors); appending a PyTorch Linear
    (W, b) gives M <- M @ W^T, c <- c @ W^T + b.  The second affine and alpha
    are pre-halved so the kernel's only transcendental is a single tanh.
    """
    def step(M, c, W, b):
        Wt = W.astype(jnp.float32).T
        return M @ Wt, c @ Wt + b.astype(jnp.float32).reshape(1, 2)

    M1, b1 = jnp.eye(2, dtype=jnp.float32), jnp.zeros((1, 2), jnp.float32)
    for wn, bn in (("wa", "ba"), ("wba", "bba"), ("wbl", "bbl"), ("wc", "bc")):
        M1, b1 = step(M1, b1, params[wn], params[bn])

    M2, b2 = jnp.eye(2, dtype=jnp.float32), jnp.zeros((1, 2), jnp.float32)
    for wn, bn in (("wdba", "bdba"), ("wdbl", "bdbl")):
        M2, b2 = step(M2, b2, params[wn], params[bn])
    M2, b2 = 0.5 * M2, 0.5 * b2

    scale = 0.5 * jnp.reshape(params["alpha"], (-1,))[0].astype(jnp.float32)

    return jnp.stack([
        M1[0, 0], M1[1, 1],          # self coefficients   (even lane, odd lane)
        M1[1, 0], M1[0, 1],          # partner coefficients
        b1[0, 0], b1[0, 1],          # bias
        M2[0, 0], M2[1, 1],
        M2[1, 0], M2[0, 1],
        b2[0, 0], b2[0, 1],
        scale,
    ])


def main_forward(x, params, *, block_rows=4096):
    """x: (N, 2) float array. Returns (N, 2) array of the same dtype."""
    n, f = x.shape
    assert f == 2
    packed = _compose_params(params)                       # (13,) f32 -> SMEM

    # Interleaved lane-dense layout: row-major flat view [f0,f1,f0,f1,...]
    # reshaped to (rows, 128).  Reshape is free; pad only when misaligned.
    flat = x.reshape(-1)
    length = 2 * n
    length_pad = pl.cdiv(length, _MIN_TILE) * _MIN_TILE
    if length_pad != length:
        flat = jnp.pad(flat, (0, length_pad - length))
    rows = length_pad // _LANES
    x2d = flat.reshape(rows, _LANES)

    # MiB-scale blocks (4096 rows -> 2 MiB/block; ~8 MiB VMEM double-buffered,
    # within v5e/v6e/v7x default scoped limits), split so the "parallel" axis
    # has >= 2 steps when there is enough data (v7x megacore sharding).
    rb = min(block_rows, max(8, pl.cdiv(pl.cdiv(rows, 2), 8) * 8))
    grid = (pl.cdiv(rows, rb),)

    out2d = pl.pallas_call(
        _main_kernel,
        out_shape=jax.ShapeDtypeStruct((rows, _LANES), x.dtype),
        grid=grid,
        in_specs=[
            pl.BlockSpec(memory_space=pltpu.MemorySpace.SMEM),   # packed coeffs
            pl.BlockSpec((rb, _LANES), lambda i: (i, 0)),
        ],
        out_specs=pl.BlockSpec((rb, _LANES), lambda i: (i, 0)),
        compiler_params=pltpu.CompilerParams(
            dimension_semantics=("parallel",)),
    )(packed, x2d)

    # Free views back to (N, 2); the slice only matters in the padded case.
    return out2d.reshape(-1)[:length].reshape(n, 2)


def init_params(key):
    """Deterministic init mimicking PyTorch Linear defaults: U(-1/sqrt(2), 1/sqrt(2))."""
    bound = 1.0 / jnp.sqrt(2.0)
    names_w = ["wa", "wba", "wbl", "wc", "wdba", "wdbl"]
    names_b = ["ba", "bba", "bbl", "bc", "bdba", "bdbl"]
    keys = jax.random.split(key, 12)
    params = {}
    for i, nm in enumerate(names_w):
        params[nm] = jax.random.uniform(keys[i], (2, 2), jnp.float32, -bound, bound)
    for i, nm in enumerate(names_b):
        params[nm] = jax.random.uniform(keys[6 + i], (1, 2), jnp.float32, -bound, bound)
    params["alpha"] = jnp.array([[0.941736]], dtype=jnp.float32)
    return params


def reference_forward(x, p):
    """Pure-JAX layer-by-layer reference (matches the PyTorch module exactly)."""
    def lin(h, w, b):
        return h @ w.T + b
    h = lin(x, p["wa"], p["ba"])
    h = lin(h, p["wba"], p["bba"])
    h = lin(h, p["wbl"], p["bbl"])
    h = jnp.maximum(lin(h, p["wc"], p["bc"]), 0.0)
    h = lin(h, p["wdba"], p["bdba"])
    h = lin(h, p["wdbl"], p["bdbl"])
    return p["alpha"][0, 0] * jax.nn.sigmoid(h)


if __name__ == "__main__":
    key = jax.random.PRNGKey(0)
    pkey, xkey1, xkey2 = jax.random.split(key, 3)
    params = init_params(pkey)

    fwd = jax.jit(main_forward)   # 2x2 affine folding happens at trace time

    # Small single-block case (batch=8) and a >1-block case (batch=600).
    for batch, xkey in ((8, xkey1), (600, xkey2)):
        x = jax.random.normal(xkey, (batch, 2), dtype=jnp.float32)
        out = jax.block_until_ready(fwd(x, params))
        ref = reference_forward(x, params)
        assert out.shape == (batch, 2)
        assert jnp.allclose(out, ref, atol=3e-5, rtol=3e-5), f"mismatch at batch={batch}"

    print("KERNEL_OK")
</pallas_src>

<mosaic_0001>
module attributes {stable_mosaic.version = 11 : i64} {
  func.func @_main_kernel(%arg0: i32, %arg1: memref<13xf32, #tpu.memory_space<smem>>, %arg2: memref<8x128xf32, #tpu.memory_space<vmem>>, %arg3: memref<8x128xf32, #tpu.memory_space<vmem>>) attributes {dimension_semantics = [#tpu.dimension_semantics<parallel>], iteration_bounds = array<i64: 1>, scalar_prefetch = 0 : i64, scratch_operands = 0 : i64, tpu.core_type = #tpu.core_type<tc>, window_params = [{transform_indices = @transform_0, window_bounds = array<i64: 13>}, {transform_indices = @transform_1, window_bounds = array<i64: 8, 128>}, {transform_indices = @transform_2, window_bounds = array<i64: 8, 128>}]} {
    %c0 = arith.constant 0 : index
    %c0_0 = arith.constant 0 : index
    %0 = vector.load %arg2[%c0, %c0_0] : memref<8x128xf32, #tpu.memory_space<vmem>>, vector<8x128xf32>
    %1 = tpu.iota {dimensions = array<i32: 1>} : vector<1x128xi32>
    %c1_i32 = arith.constant 1 : i32
    %2 = vector.broadcast %c1_i32 : i32 to vector<1x128xi32>
    %3 = arith.andi %1, %2 : vector<1x128xi32>
    %c0_i32 = arith.constant 0 : i32
    %4 = vector.broadcast %c0_i32 : i32 to vector<1x128xi32>
    %5 = arith.cmpi eq, %3, %4 : vector<1x128xi32>
    %c0_1 = arith.constant 0 : index
    %6 = memref.load %arg1[%c0_1] : memref<13xf32, #tpu.memory_space<smem>>
    %c1 = arith.constant 1 : index
    %7 = memref.load %arg1[%c1] : memref<13xf32, #tpu.memory_space<smem>>
    %8 = vector.broadcast %6 : f32 to vector<1x128xf32>
    %9 = vector.broadcast %7 : f32 to vector<1x128xf32>
    %10 = arith.select %5, %8, %9 : vector<1x128xi1>, vector<1x128xf32>
    %11 = vector.broadcast %10 : vector<1x128xf32> to vector<8x128xf32>
    %12 = arith.mulf %0, %11 : vector<8x128xf32>
    %c127_i32 = arith.constant 127 : i32
    %13 = tpu.dynamic_rotate %0 by %c127_i32 dim 1 : vector<8x128xf32>, i32 -> vector<8x128xf32>
    %c1_i32_2 = arith.constant 1 : i32
    %14 = tpu.dynamic_rotate %0 by %c1_i32_2 dim 1 : vector<8x128xf32>, i32 -> vector<8x128xf32>
    %15 = vector.shape_cast %5 : vector<1x128xi1> to vector<1x128xi1>
    %16 = vector.broadcast %15 : vector<1x128xi1> to vector<8x128xi1>
    %17 = arith.select %16, %13, %14 : vector<8x128xi1>, vector<8x128xf32>
    %c2 = arith.constant 2 : index
    %18 = memref.load %arg1[%c2] : memref<13xf32, #tpu.memory_space<smem>>
    %c3 = arith.constant 3 : index
    %19 = memref.load %arg1[%c3] : memref<13xf32, #tpu.memory_space<smem>>
    %20 = vector.broadcast %18 : f32 to vector<1x128xf32>
    %21 = vector.broadcast %19 : f32 to vector<1x128xf32>
    %22 = arith.select %5, %20, %21 : vector<1x128xi1>, vector<1x128xf32>
    %23 = vector.broadcast %22 : vector<1x128xf32> to vector<8x128xf32>
    %24 = arith.mulf %17, %23 : vector<8x128xf32>
    %25 = arith.addf %12, %24 : vector<8x128xf32>
    %c4 = arith.constant 4 : index
    %26 = memref.load %arg1[%c4] : memref<13xf32, #tpu.memory_space<smem>>
    %c5 = arith.constant 5 : index
    %27 = memref.load %arg1[%c5] : memref<13xf32, #tpu.memory_space<smem>>
    %28 = vector.broadcast %26 : f32 to vector<1x128xf32>
    %29 = vector.broadcast %27 : f32 to vector<1x128xf32>
    %30 = arith.select %5, %28, %29 : vector<1x128xi1>, vector<1x128xf32>
    %31 = vector.broadcast %30 : vector<1x128xf32> to vector<8x128xf32>
    %32 = arith.addf %25, %31 : vector<8x128xf32>
    %cst = arith.constant 0.000000e+00 : f32
    %33 = vector.broadcast %cst : f32 to vector<8x128xf32>
    %34 = arith.maximumf %32, %33 : vector<8x128xf32>
    %c6 = arith.constant 6 : index
    %35 = memref.load %arg1[%c6] : memref<13xf32, #tpu.memory_space<smem>>
    %c7 = arith.constant 7 : index
    %36 = memref.load %arg1[%c7] : memref<13xf32, #tpu.memory_space<smem>>
    %37 = vector.broadcast %35 : f32 to vector<1x128xf32>
    %38 = vector.broadcast %36 : f32 to vector<1x128xf32>
    %39 = arith.select %5, %37, %38 : vector<1x128xi1>, vector<1x128xf32>
    %40 = vector.broadcast %39 : vector<1x128xf32> to vector<8x128xf32>
    %41 = arith.mulf %34, %40 : vector<8x128xf32>
    %c127_i32_3 = arith.constant 127 : i32
    %42 = tpu.dynamic_rotate %34 by %c127_i32_3 dim 1 : vector<8x128xf32>, i32 -> vector<8x128xf32>
    %c1_i32_4 = arith.constant 1 : i32
    %43 = tpu.dynamic_rotate %34 by %c1_i32_4 dim 1 : vector<8x128xf32>, i32 -> vector<8x128xf32>
    %44 = vector.shape_cast %5 : vector<1x128xi1> to vector<1x128xi1>
    %45 = vector.broadcast %44 : vector<1x128xi1> to vector<8x128xi1>
    %46 = arith.select %45, %42, %43 : vector<8x128xi1>, vector<8x128xf32>
    %c8 = arith.constant 8 : index
    %47 = memref.load %arg1[%c8] : memref<13xf32, #tpu.memory_space<smem>>
    %c9 = arith.constant 9 : index
    %48 = memref.load %arg1[%c9] : memref<13xf32, #tpu.memory_space<smem>>
    %49 = vector.broadcast %47 : f32 to vector<1x128xf32>
    %50 = vector.broadcast %48 : f32 to vector<1x128xf32>
    %51 = arith.select %5, %49, %50 : vector<1x128xi1>, vector<1x128xf32>
    %52 = vector.broadcast %51 : vector<1x128xf32> to vector<8x128xf32>
    %53 = arith.mulf %46, %52 : vector<8x128xf32>
    %54 = arith.addf %41, %53 : vector<8x128xf32>
    %c10 = arith.constant 10 : index
    %55 = memref.load %arg1[%c10] : memref<13xf32, #tpu.memory_space<smem>>
    %c11 = arith.constant 11 : index
    %56 = memref.load %arg1[%c11] : memref<13xf32, #tpu.memory_space<smem>>
    %57 = vector.broadcast %55 : f32 to vector<1x128xf32>
    %58 = vector.broadcast %56 : f32 to vector<1x128xf32>
    %59 = arith.select %5, %57, %58 : vector<1x128xi1>, vector<1x128xf32>
    %60 = vector.broadcast %59 : vector<1x128xf32> to vector<8x128xf32>
    %61 = arith.addf %54, %60 : vector<8x128xf32>
    %c12 = arith.constant 12 : index
    %62 = memref.load %arg1[%c12] : memref<13xf32, #tpu.memory_space<smem>>
    %63 = math.tanh %61 : vector<8x128xf32>
    %64 = vector.broadcast %62 : f32 to vector<8x128xf32>
    %65 = arith.mulf %64, %63 : vector<8x128xf32>
    %66 = vector.broadcast %62 : f32 to vector<8x128xf32>
    %67 = arith.addf %65, %66 : vector<8x128xf32>
    %c0_5 = arith.constant 0 : index
    %c0_6 = arith.constant 0 : index
    %68 = vector.load %arg3[%c0_5, %c0_6] : memref<8x128xf32, #tpu.memory_space<vmem>>, vector<8x128xf32>
    tpu.vector_store %arg3[%c0_5, %c0_6], %67 {strides = array<i32>} : memref<8x128xf32, #tpu.memory_space<vmem>>, vector<8x128xf32>,
    return
  }
  func.func @transform_0(%arg0: i32) -> i32 {
    %c0_i32 = arith.constant 0 : i32
    %c0_i32_0 = arith.constant 0 : i32
    return %c0_i32 : i32
  }
  func.func @transform_1(%arg0: i32) -> (i32, i32) {
    %c0_i32 = arith.constant 0 : i32
    %c0_i32_0 = arith.constant 0 : i32
    return %arg0, %c0_i32 : i32, i32
  }
  func.func @transform_2(%arg0: i32) -> (i32, i32) {
    %c0_i32 = arith.constant 0 : i32
    %c0_i32_0 = arith.constant 0 : i32
    return %arg0, %c0_i32 : i32, i32
  }
}

</mosaic_0001>

<bundles_post_ra>
// kernel: main_forward.1
= control target key start
LH: loop header
LB: loop body
LE: loop exit
PB: predicated region body
PF: predicated region fallthrough
CT: control target
= control target key end

     0   :  { %7 = vsyncpa [#allocation3], 0  ;;  %s173_s0 = inlined_call_operand.vmem [shape: f32[13], index: 0, kind: input, shape index: {}]   ;;  %s174_s1 = inlined_call_operand.vmem [shape: f32[8,128], index: 1, kind: input, shape index: {}]   ;;  %s175_s2 = inlined_call_operand.vmem [shape: f32[8,128], index: 2, kind: output, shape index: {}]  }
   0x1   :  { %s14_s11 = sshll.u32 %s173_s0, 4  ;;  %s15_s11 = int_to_ptr.vmem [resolvable:$true] %s14_s11 }
   0x2   :  { %s108_s12 = scalar_lea.vmem %s15_s11, 16  ;;  %p113_p1 = scmp.lt.s32.totalorder %s15_s11, %s15_s11 }
   0x3   :  { %p109_p0 = scmp.ne.s32.totalorder %s15_s11, %s108_s12  ;;  %p114_p2 = scmp.lt.s32.totalorder %s108_s12, %s108_s12 }
   0x5   :  { %p115_p3 = por %p114_p2, %p113_p1 }
   0x7   :  { %p116_p4 = pnand %p115_p3, %p109_p0 }
   0x9   :  { %119 = shalt.err (!%p116_p4)
}
   0xa   :  { %s122_s13 = smov [#allocation2]  }
   0xb   :  { %17 = dma.vmem_to_smem %s15_s11, 16, %s122_s13, [#allocation3]  }
   0xc   :  { %120 = dma.done.wait [#allocation3], 16  }
   0xd   :  { %121 = vsyncadd [#allocation3], 4294967280 }
   0xe   :  { %23 = sfence }
   0xf   :  { %v24_v0 = vld [vmem:[%s174_s1] sm:$0xff]  ;;  %s123_s16 = smov 127   ;;  %s124_s0 = smov 1   ;;  %v25_v1 = vlaneseq }
  0x10   :  { %35 = vrot.lane.b32.xlu0 %v24_v0, %s123_s16  ;;  %s29_s17 = sld [smem:[#allocation2]] }
  0x11   :  { %v26_v2 = vand.u32 127, %v25_v1  ;;  %s91_s18 = sld [smem:[#allocation2 + $0x1]] }
  0x12   :  { %s92_s19 = sld [smem:[#allocation2 + $0x2]] }
  0x13   :  { %s93_s20 = sld [smem:[#allocation2 + $0x3]]  ;;  %v27_v3 = vand.u32 1, %v26_v2 }
  0x14   :  { %37 = vrot.lane.b32.xlu0 %v24_v0, %s124_s0  ;;  %s94_s21 = sld [smem:[#allocation2 + $0x4]] }
  0x15   :  { %s95_s22 = sld [smem:[#allocation2 + $0x5]]  ;;  %vm148_vm0 = vcmp.eq.s32.totalorder %v27_v3, 0 }
  0x16   :  { %v31_v5 = vstv %s29_s17  ;;  %s96_s1 = sld [smem:[#allocation2 + $0x6]] }
  0x17   :  { %v32_v6 = vstv %s91_s18  ;;  %s97_s23 = sld [smem:[#allocation2 + $0x7]] }
  0x18   :  { %v44_v8 = vstv %s92_s19  ;;  %v33_v10 = vsel %vm148_vm0, %v31_v5, %v32_v6  ;;  %s98_s24 = sld [smem:[#allocation2 + $0x8]] }
  0x19   :  { %v45_v9 = vstv %s93_s20  ;;  %v34_v12 = vmul.f32 %v33_v10, %v24_v0  ;;  %s99_s25 = sld [smem:[#allocation2 + $0x9]] }
  0x1a   :  { %v46_v11 = vsel %vm148_vm0, %v44_v8, %v45_v9  ;;  %v51_v14 = vstv %s94_s21  ;;  %s100_s26 = sld [smem:[#allocation2 + $0xa]] }
  0x1b   :  { %v52_v15 = vstv %s95_s22  ;;  %s101_s27 = sld [smem:[#allocation2 + $0xb]] }
  0x1c   :  { %v53_v18 = vsel %vm148_vm0, %v51_v14, %v52_v15  ;;  %v58_v23 = vstv %s96_s1  ;;  %s102_s28 = sld [smem:[#allocation2 + $0xc]] }
  0x1d   :  { %v59_v24 = vstv %s97_s23 }
  0x1e   :  { %v69_v25 = vstv %s98_s24  ;;  %v60_v27 = vsel %vm148_vm0, %v58_v23, %v59_v24 }
  0x1f   :  { %v70_v26 = vstv %s99_s25 }
  0x20   :  { %v71_v28 = vsel %vm148_vm0, %v69_v25, %v70_v26  ;;  %v76_v29 = vstv %s100_s26 }
  0x21   :  { %v77_v30 = vstv %s101_s27 }
  0x22   :  { %v78_v35 = vsel %vm148_vm0, %v76_v29, %v77_v30  ;;  %v82_v38 = vstv %s102_s28 }
  0x82   :  { %v36_v7 = vpop.permute.xlu0 %35 }
  0x86   :  { %v38_v13 = vpop.permute.xlu0 %37 }
  0x87   :  { %v41_v16 = vsel %vm148_vm0, %v36_v7, %v38_v13 }
  0x88   :  { %v47_v17 = vmul.f32 %v46_v11, %v41_v16 }
  0x8a   :  { %v48_v19 = vadd.f32 %v47_v17, %v34_v12 }
  0x8c   :  { %v54_v20 = vadd.f32 %v53_v18, %v48_v19 }
  0x8e   :  { %v55_v21 = vmax.f32 %v54_v20, 0.0 }
  0x90   :  { %62 = vrot.lane.b32.xlu1 %v55_v21, %s123_s16  ;;  %v61_v33 = vmul.f32 %v60_v27, %v55_v21 }
  0x94   :  { %64 = vrot.lane.b32.xlu1 %v55_v21, %s124_s0 }
 0x102   :  { %v63_v22 = vpop.permute.xlu1 %62 }
 0x106   :  { %v65_v31 = vpop.permute.xlu1 %64 }
 0x107   :  { %v66_v32 = vsel %vm148_vm0, %v63_v22, %v65_v31 }
 0x108   :  { %v72_v34 = vmul.f32 %v71_v28, %v66_v32 }
 0x10a   :  { %v73_v36 = vadd.f32 %v72_v34, %v61_v33 }
 0x10c   :  { %v79_v37 = vadd.f32 %v78_v35, %v73_v36 }
 0x10e   :  { %106 = vtanh.f32 %v79_v37 }
 0x11b   :  { %v107_v39 = vpop.eup %106 }
 0x11c   :  { %v83_v40 = vmul.f32 %v107_v39, %v82_v38 }
 0x11e   :  { %v84_v41 = vadd.f32 %v83_v40, %v82_v38 }
 0x120   :  { %85 = vst [vmem:[%s175_s2] sm:$0xff] %v84_v41 }
 0x121   :  { %90 = vsyncpa [#allocation3], 1 }

</bundles_post_ra>
